<compile_context>
chip_gen: v5e
topology: v5e:2x2
jax: 0.10.0
libtpu: 0.0.40
codegen_flags: <defaults>
</compile_context>

<pallas_src>
import functools

import jax
import jax.numpy as jnp
from jax.experimental import pallas as pl
from jax.experimental.pallas import tpu as pltpu


def _round_up(x, m):
    return ((x + m - 1) // m) * m


def _sublane_multiple(dtype):
    # Second-to-last block dim must be a multiple of 8 (32-bit), 16 (16-bit),
    # or 32 (8-bit).
    return max(8, 32 // jnp.dtype(dtype).itemsize)


def _clip_embedding_kernel(bb, tq, tok_ref, emb_hbm, pos_ref, out_ref,
                           gather_buf, sem):
    # tok_ref    : SMEM (B_pad, T_pad) int32  -- scalar-prefetched token ids
    # emb_hbm    : HBM  (V, E)                -- embedding table (manual gather)
    # pos_ref    : VMEM (T_pad, E)            -- whole positional table, resident
    # out_ref    : VMEM (BB, TQ, E)           -- output tile
    # gather_buf : VMEM (BB*TQ, E) scratch
    # sem        : scalar DMA semaphore shared by all row gathers of this tile
    b0 = pl.program_id(0) * bb
    t0 = pl.program_id(1) * tq

    # Issue every row-gather DMA for this tile up front (all in flight
    # concurrently), then wait for all of them before touching gather_buf.
    copies = []
    for rb in range(bb):
        for rt in range(tq):
            tok = tok_ref[b0 + rb, t0 + rt]
            cp = pltpu.make_async_copy(
                emb_hbm.at[pl.ds(tok, 1), :],
                gather_buf.at[pl.ds(rb * tq + rt, 1), :],
                sem,
            )
            cp.start()
            copies.append(cp)
    for cp in copies:
        cp.wait()

    # Positional rows for this tile; whole (padded) table is VMEM-resident.
    if pos_ref.shape[0] == tq:
        pos = pos_ref[...]
    else:
        pos = pos_ref[pl.ds(pl.multiple_of(t0, tq), tq), :]

    for rb in range(bb):
        rows = gather_buf[pl.ds(rb * tq, tq), :]   # static slice: free view
        out_ref[rb, :, :] = (rows + pos).astype(out_ref.dtype)


def clip_embedding(tokens, emb_table, pos_emb, *, bb=8, tq=None):
    """tokens: (B, T) int; emb_table: (V, E); pos_emb: (T, E) -> (B, T, E).

    bb: batch rows per grid step (keep <= ~4 on v5e's 16 MiB scoped VMEM).
    tq: token rows per grid step; default covers the whole sublane-rounded
        sequence, so CLIP's T=77 becomes a single 80-row tile per batch row.
    """
    B, T = tokens.shape
    V, E = emb_table.shape
    assert pos_emb.shape == (T, E)

    out_dtype = jnp.result_type(emb_table.dtype, pos_emb.dtype)
    sub = max(_sublane_multiple(emb_table.dtype),
              _sublane_multiple(pos_emb.dtype),
              _sublane_multiple(out_dtype))

    if tq is None:
        tq = min(_round_up(T, sub), 512)
    tq = _round_up(min(tq, _round_up(T, sub)), sub)
    n_t = -(-T // tq)
    t_pad = n_t * tq

    bb = max(1, min(bb, B))
    n_b = -(-B // bb)
    b_pad = n_b * bb

    tokens = tokens.astype(jnp.int32)
    if (b_pad, t_pad) != (B, T):
        # Tiny pad of the int token ids only; padded positions gather row 0 and
        # their output rows are dropped by the masked ragged output blocks.
        tokens = jnp.pad(tokens, ((0, b_pad - B), (0, t_pad - T)))
    if t_pad != T:
        pos_emb = jnp.pad(pos_emb, ((0, t_pad - T), (0, 0)))

    grid_spec = pltpu.PrefetchScalarGridSpec(
        num_scalar_prefetch=1,
        grid=(n_b, n_t),
        in_specs=[
            # Embedding table: leave in HBM, gather rows manually in-kernel.
            pl.BlockSpec(memory_space=pl.ANY),
            # Positional embedding: whole (padded) table with a constant block
            # index -> fetched into VMEM once, never re-DMAed per step.
            pl.BlockSpec((t_pad, E), lambda ib, it, tok: (0, 0)),
        ],
        out_specs=pl.BlockSpec((bb, tq, E), lambda ib, it, tok: (ib, it, 0)),
        scratch_shapes=[
            pltpu.VMEM((bb * tq, E), emb_table.dtype),
            pltpu.SemaphoreType.DMA(()),
        ],
    )

    return pl.pallas_call(
        functools.partial(_clip_embedding_kernel, bb, tq),
        out_shape=jax.ShapeDtypeStruct((B, T, E), out_dtype),
        grid_spec=grid_spec,
        compiler_params=pltpu.CompilerParams(
            dimension_semantics=("parallel", "arbitrary"),
        ),
    )(tokens, emb_table, pos_emb)


if __name__ == "__main__":
    # Small shapes consistent with CLIPEmbedding(n_vocab, n_embd, n_token).
    n_vocab, n_embd, n_token, batch = 64, 128, 8, 2

    key = jax.random.PRNGKey(0)
    k_emb, k_pos, k_tok = jax.random.split(key, 3)

    # nn.Embedding(n_vocab, n_embd).weight and nn.Parameter((n_token, n_embd)).
    emb_table = jax.random.normal(k_emb, (n_vocab, n_embd), dtype=jnp.float32)
    # PyTorch inits position_embedding to zeros; use small random values here
    # so the broadcast-add is actually exercised (still deterministic).
    pos_emb = 0.01 * jax.random.normal(k_pos, (n_token, n_embd), dtype=jnp.float32)

    tokens = jax.random.randint(k_tok, (batch, n_token), 0, n_vocab, dtype=jnp.int32)

    out = clip_embedding(tokens, emb_table, pos_emb)
    out = jax.block_until_ready(out)

    # Pure-JAX reference.
    ref = emb_table[tokens] + pos_emb[None, :, :]
    assert out.shape == (batch, n_token, n_embd)
    assert out.dtype == ref.dtype
    assert jnp.allclose(out, ref, atol=1e-6, rtol=1e-6)

    print("KERNEL_OK")
</pallas_src>

<mosaic_0001>
module attributes {stable_mosaic.version = 11 : i64} {
  func.func @_clip_embedding_kernel(%arg0: i32, %arg1: i32, %arg2: memref<2x8xi32, #tpu.memory_space<smem>>, %arg3: memref<64x128xf32, #tpu.memory_space<any>>, %arg4: memref<8x128xf32, #tpu.memory_space<vmem>>, %arg5: memref<2x8x128xf32, #tpu.memory_space<vmem>>, %arg6: memref<16x128xf32, #tpu.memory_space<vmem>>, %arg7: memref<!tpu.dma_semaphore, #tpu.memory_space<semaphore_mem>>) attributes {dimension_semantics = [#tpu.dimension_semantics<parallel>, #tpu.dimension_semantics<arbitrary>], iteration_bounds = array<i64: 1, 1>, scalar_prefetch = 1 : i64, scratch_operands = 2 : i64, tpu.core_type = #tpu.core_type<tc>, window_params = [{}, {pipeline_mode = #tpu.pipeline_mode<synchronous>, transform_indices = @transform_1, window_bounds = array<i64: 8, 128>}, {transform_indices = @transform_2, window_bounds = array<i64: 2, 8, 128>}]} {
    %c2_i32 = arith.constant 2 : i32
    %0 = arith.muli %arg0, %c2_i32 : i32
    %c8_i32 = arith.constant 8 : i32
    %1 = arith.muli %arg1, %c8_i32 : i32
    %c0_i32 = arith.constant 0 : i32
    %2 = arith.addi %0, %c0_i32 : i32
    %c0_i32_0 = arith.constant 0 : i32
    %3 = arith.addi %1, %c0_i32_0 : i32
    %4 = arith.index_cast %2 : i32 to index
    %5 = arith.index_cast %3 : i32 to index
    %6 = memref.load %arg2[%4, %5] : memref<2x8xi32, #tpu.memory_space<smem>>
    %c0_i32_1 = arith.constant 0 : i32
    %7 = tpu.memref_slice %arg3[%6, %c0_i32_1] : memref<64x128xf32, #tpu.memory_space<any>> -> memref<1x128xf32, #tpu.memory_space<any>>
    %c0_i32_2 = arith.constant 0 : i32
    %c0_i32_3 = arith.constant 0 : i32
    %8 = tpu.memref_slice %arg6[%c0_i32_2, %c0_i32_3] : memref<16x128xf32, #tpu.memory_space<vmem>> -> memref<1x128xf32, #tpu.memory_space<vmem>>
    tpu.enqueue_dma source(%7 : memref<1x128xf32, #tpu.memory_space<any>>) target(%8 : memref<1x128xf32, #tpu.memory_space<vmem>>) target_semaphore(%arg7 : memref<!tpu.dma_semaphore, #tpu.memory_space<semaphore_mem>>)
    %c0_i32_4 = arith.constant 0 : i32
    %9 = arith.addi %0, %c0_i32_4 : i32
    %c1_i32 = arith.constant 1 : i32
    %10 = arith.addi %1, %c1_i32 : i32
    %11 = arith.index_cast %9 : i32 to index
    %12 = arith.index_cast %10 : i32 to index
    %13 = memref.load %arg2[%11, %12] : memref<2x8xi32, #tpu.memory_space<smem>>
    %c0_i32_5 = arith.constant 0 : i32
    %14 = tpu.memref_slice %arg3[%13, %c0_i32_5] : memref<64x128xf32, #tpu.memory_space<any>> -> memref<1x128xf32, #tpu.memory_space<any>>
    %c1_i32_6 = arith.constant 1 : i32
    %c0_i32_7 = arith.constant 0 : i32
    %15 = tpu.memref_slice %arg6[%c1_i32_6, %c0_i32_7] : memref<16x128xf32, #tpu.memory_space<vmem>> -> memref<1x128xf32, #tpu.memory_space<vmem>>
    tpu.enqueue_dma source(%14 : memref<1x128xf32, #tpu.memory_space<any>>) target(%15 : memref<1x128xf32, #tpu.memory_space<vmem>>) target_semaphore(%arg7 : memref<!tpu.dma_semaphore, #tpu.memory_space<semaphore_mem>>)
    %c0_i32_8 = arith.constant 0 : i32
    %16 = arith.addi %0, %c0_i32_8 : i32
    %c2_i32_9 = arith.constant 2 : i32
    %17 = arith.addi %1, %c2_i32_9 : i32
    %18 = arith.index_cast %16 : i32 to index
    %19 = arith.index_cast %17 : i32 to index
    %20 = memref.load %arg2[%18, %19] : memref<2x8xi32, #tpu.memory_space<smem>>
    %c0_i32_10 = arith.constant 0 : i32
    %21 = tpu.memref_slice %arg3[%20, %c0_i32_10] : memref<64x128xf32, #tpu.memory_space<any>> -> memref<1x128xf32, #tpu.memory_space<any>>
    %c2_i32_11 = arith.constant 2 : i32
    %c0_i32_12 = arith.constant 0 : i32
    %22 = tpu.memref_slice %arg6[%c2_i32_11, %c0_i32_12] : memref<16x128xf32, #tpu.memory_space<vmem>> -> memref<1x128xf32, #tpu.memory_space<vmem>>
    tpu.enqueue_dma source(%21 : memref<1x128xf32, #tpu.memory_space<any>>) target(%22 : memref<1x128xf32, #tpu.memory_space<vmem>>) target_semaphore(%arg7 : memref<!tpu.dma_semaphore, #tpu.memory_space<semaphore_mem>>)
    %c0_i32_13 = arith.constant 0 : i32
    %23 = arith.addi %0, %c0_i32_13 : i32
    %c3_i32 = arith.constant 3 : i32
    %24 = arith.addi %1, %c3_i32 : i32
    %25 = arith.index_cast %23 : i32 to index
    %26 = arith.index_cast %24 : i32 to index
    %27 = memref.load %arg2[%25, %26] : memref<2x8xi32, #tpu.memory_space<smem>>
    %c0_i32_14 = arith.constant 0 : i32
    %28 = tpu.memref_slice %arg3[%27, %c0_i32_14] : memref<64x128xf32, #tpu.memory_space<any>> -> memref<1x128xf32, #tpu.memory_space<any>>
    %c3_i32_15 = arith.constant 3 : i32
    %c0_i32_16 = arith.constant 0 : i32
    %29 = tpu.memref_slice %arg6[%c3_i32_15, %c0_i32_16] : memref<16x128xf32, #tpu.memory_space<vmem>> -> memref<1x128xf32, #tpu.memory_space<vmem>>
    tpu.enqueue_dma source(%28 : memref<1x128xf32, #tpu.memory_space<any>>) target(%29 : memref<1x128xf32, #tpu.memory_space<vmem>>) target_semaphore(%arg7 : memref<!tpu.dma_semaphore, #tpu.memory_space<semaphore_mem>>)
    %c0_i32_17 = arith.constant 0 : i32
    %30 = arith.addi %0, %c0_i32_17 : i32
    %c4_i32 = arith.constant 4 : i32
    %31 = arith.addi %1, %c4_i32 : i32
    %32 = arith.index_cast %30 : i32 to index
    %33 = arith.index_cast %31 : i32 to index
    %34 = memref.load %arg2[%32, %33] : memref<2x8xi32, #tpu.memory_space<smem>>
    %c0_i32_18 = arith.constant 0 : i32
    %35 = tpu.memref_slice %arg3[%34, %c0_i32_18] : memref<64x128xf32, #tpu.memory_space<any>> -> memref<1x128xf32, #tpu.memory_space<any>>
    %c4_i32_19 = arith.constant 4 : i32
    %c0_i32_20 = arith.constant 0 : i32
    %36 = tpu.memref_slice %arg6[%c4_i32_19, %c0_i32_20] : memref<16x128xf32, #tpu.memory_space<vmem>> -> memref<1x128xf32, #tpu.memory_space<vmem>>
    tpu.enqueue_dma source(%35 : memref<1x128xf32, #tpu.memory_space<any>>) target(%36 : memref<1x128xf32, #tpu.memory_space<vmem>>) target_semaphore(%arg7 : memref<!tpu.dma_semaphore, #tpu.memory_space<semaphore_mem>>)
    %c0_i32_21 = arith.constant 0 : i32
    %37 = arith.addi %0, %c0_i32_21 : i32
    %c5_i32 = arith.constant 5 : i32
    %38 = arith.addi %1, %c5_i32 : i32
    %39 = arith.index_cast %37 : i32 to index
    %40 = arith.index_cast %38 : i32 to index
    %41 = memref.load %arg2[%39, %40] : memref<2x8xi32, #tpu.memory_space<smem>>
    %c0_i32_22 = arith.constant 0 : i32
    %42 = tpu.memref_slice %arg3[%41, %c0_i32_22] : memref<64x128xf32, #tpu.memory_space<any>> -> memref<1x128xf32, #tpu.memory_space<any>>
    %c5_i32_23 = arith.constant 5 : i32
    %c0_i32_24 = arith.constant 0 : i32
    %43 = tpu.memref_slice %arg6[%c5_i32_23, %c0_i32_24] : memref<16x128xf32, #tpu.memory_space<vmem>> -> memref<1x128xf32, #tpu.memory_space<vmem>>
    tpu.enqueue_dma source(%42 : memref<1x128xf32, #tpu.memory_space<any>>) target(%43 : memref<1x128xf32, #tpu.memory_space<vmem>>) target_semaphore(%arg7 : memref<!tpu.dma_semaphore, #tpu.memory_space<semaphore_mem>>)
    %c0_i32_25 = arith.constant 0 : i32
    %44 = arith.addi %0, %c0_i32_25 : i32
    %c6_i32 = arith.constant 6 : i32
    %45 = arith.addi %1, %c6_i32 : i32
    %46 = arith.index_cast %44 : i32 to index
    %47 = arith.index_cast %45 : i32 to index
    %48 = memref.load %arg2[%46, %47] : memref<2x8xi32, #tpu.memory_space<smem>>
    %c0_i32_26 = arith.constant 0 : i32
    %49 = tpu.memref_slice %arg3[%48, %c0_i32_26] : memref<64x128xf32, #tpu.memory_space<any>> -> memref<1x128xf32, #tpu.memory_space<any>>
    %c6_i32_27 = arith.constant 6 : i32
    %c0_i32_28 = arith.constant 0 : i32
    %50 = tpu.memref_slice %arg6[%c6_i32_27, %c0_i32_28] : memref<16x128xf32, #tpu.memory_space<vmem>> -> memref<1x128xf32, #tpu.memory_space<vmem>>
    tpu.enqueue_dma source(%49 : memref<1x128xf32, #tpu.memory_space<any>>) target(%50 : memref<1x128xf32, #tpu.memory_space<vmem>>) target_semaphore(%arg7 : memref<!tpu.dma_semaphore, #tpu.memory_space<semaphore_mem>>)
    %c0_i32_29 = arith.constant 0 : i32
    %51 = arith.addi %0, %c0_i32_29 : i32
    %c7_i32 = arith.constant 7 : i32
    %52 = arith.addi %1, %c7_i32 : i32
    %53 = arith.index_cast %51 : i32 to index
    %54 = arith.index_cast %52 : i32 to index
    %55 = memref.load %arg2[%53, %54] : memref<2x8xi32, #tpu.memory_space<smem>>
    %c0_i32_30 = arith.constant 0 : i32
    %56 = tpu.memref_slice %arg3[%55, %c0_i32_30] : memref<64x128xf32, #tpu.memory_space<any>> -> memref<1x128xf32, #tpu.memory_space<any>>
    %c7_i32_31 = arith.constant 7 : i32
    %c0_i32_32 = arith.constant 0 : i32
    %57 = tpu.memref_slice %arg6[%c7_i32_31, %c0_i32_32] : memref<16x128xf32, #tpu.memory_space<vmem>> -> memref<1x128xf32, #tpu.memory_space<vmem>>
    tpu.enqueue_dma source(%56 : memref<1x128xf32, #tpu.memory_space<any>>) target(%57 : memref<1x128xf32, #tpu.memory_space<vmem>>) target_semaphore(%arg7 : memref<!tpu.dma_semaphore, #tpu.memory_space<semaphore_mem>>)
    %c1_i32_33 = arith.constant 1 : i32
    %58 = arith.addi %0, %c1_i32_33 : i32
    %c0_i32_34 = arith.constant 0 : i32
    %59 = arith.addi %1, %c0_i32_34 : i32
    %60 = arith.index_cast %58 : i32 to index
    %61 = arith.index_cast %59 : i32 to index
    %62 = memref.load %arg2[%60, %61] : memref<2x8xi32, #tpu.memory_space<smem>>
    %c0_i32_35 = arith.constant 0 : i32
    %63 = tpu.memref_slice %arg3[%62, %c0_i32_35] : memref<64x128xf32, #tpu.memory_space<any>> -> memref<1x128xf32, #tpu.memory_space<any>>
    %c8_i32_36 = arith.constant 8 : i32
    %c0_i32_37 = arith.constant 0 : i32
    %64 = tpu.memref_slice %arg6[%c8_i32_36, %c0_i32_37] : memref<16x128xf32, #tpu.memory_space<vmem>> -> memref<1x128xf32, #tpu.memory_space<vmem>>
    tpu.enqueue_dma source(%63 : memref<1x128xf32, #tpu.memory_space<any>>) target(%64 : memref<1x128xf32, #tpu.memory_space<vmem>>) target_semaphore(%arg7 : memref<!tpu.dma_semaphore, #tpu.memory_space<semaphore_mem>>)
    %c1_i32_38 = arith.constant 1 : i32
    %65 = arith.addi %0, %c1_i32_38 : i32
    %c1_i32_39 = arith.constant 1 : i32
    %66 = arith.addi %1, %c1_i32_39 : i32
    %67 = arith.index_cast %65 : i32 to index
    %68 = arith.index_cast %66 : i32 to index
    %69 = memref.load %arg2[%67, %68] : memref<2x8xi32, #tpu.memory_space<smem>>
    %c0_i32_40 = arith.constant 0 : i32
    %70 = tpu.memref_slice %arg3[%69, %c0_i32_40] : memref<64x128xf32, #tpu.memory_space<any>> -> memref<1x128xf32, #tpu.memory_space<any>>
    %c9_i32 = arith.constant 9 : i32
    %c0_i32_41 = arith.constant 0 : i32
    %71 = tpu.memref_slice %arg6[%c9_i32, %c0_i32_41] : memref<16x128xf32, #tpu.memory_space<vmem>> -> memref<1x128xf32, #tpu.memory_space<vmem>>
    tpu.enqueue_dma source(%70 : memref<1x128xf32, #tpu.memory_space<any>>) target(%71 : memref<1x128xf32, #tpu.memory_space<vmem>>) target_semaphore(%arg7 : memref<!tpu.dma_semaphore, #tpu.memory_space<semaphore_mem>>)
    %c1_i32_42 = arith.constant 1 : i32
    %72 = arith.addi %0, %c1_i32_42 : i32
    %c2_i32_43 = arith.constant 2 : i32
    %73 = arith.addi %1, %c2_i32_43 : i32
    %74 = arith.index_cast %72 : i32 to index
    %75 = arith.index_cast %73 : i32 to index
    %76 = memref.load %arg2[%74, %75] : memref<2x8xi32, #tpu.memory_space<smem>>
    %c0_i32_44 = arith.constant 0 : i32
    %77 = tpu.memref_slice %arg3[%76, %c0_i32_44] : memref<64x128xf32, #tpu.memory_space<any>> -> memref<1x128xf32, #tpu.memory_space<any>>
    %c10_i32 = arith.constant 10 : i32
    %c0_i32_45 = arith.constant 0 : i32
    %78 = tpu.memref_slice %arg6[%c10_i32, %c0_i32_45] : memref<16x128xf32, #tpu.memory_space<vmem>> -> memref<1x128xf32, #tpu.memory_space<vmem>>
    tpu.enqueue_dma source(%77 : memref<1x128xf32, #tpu.memory_space<any>>) target(%78 : memref<1x128xf32, #tpu.memory_space<vmem>>) target_semaphore(%arg7 : memref<!tpu.dma_semaphore, #tpu.memory_space<semaphore_mem>>)
    %c1_i32_46 = arith.constant 1 : i32
    %79 = arith.addi %0, %c1_i32_46 : i32
    %c3_i32_47 = arith.constant 3 : i32
    %80 = arith.addi %1, %c3_i32_47 : i32
    %81 = arith.index_cast %79 : i32 to index
    %82 = arith.index_cast %80 : i32 to index
    %83 = memref.load %arg2[%81, %82] : memref<2x8xi32, #tpu.memory_space<smem>>
    %c0_i32_48 = arith.constant 0 : i32
    %84 = tpu.memref_slice %arg3[%83, %c0_i32_48] : memref<64x128xf32, #tpu.memory_space<any>> -> memref<1x128xf32, #tpu.memory_space<any>>
    %c11_i32 = arith.constant 11 : i32
    %c0_i32_49 = arith.constant 0 : i32
    %85 = tpu.memref_slice %arg6[%c11_i32, %c0_i32_49] : memref<16x128xf32, #tpu.memory_space<vmem>> -> memref<1x128xf32, #tpu.memory_space<vmem>>
    tpu.enqueue_dma source(%84 : memref<1x128xf32, #tpu.memory_space<any>>) target(%85 : memref<1x128xf32, #tpu.memory_space<vmem>>) target_semaphore(%arg7 : memref<!tpu.dma_semaphore, #tpu.memory_space<semaphore_mem>>)
    %c1_i32_50 = arith.constant 1 : i32
    %86 = arith.addi %0, %c1_i32_50 : i32
    %c4_i32_51 = arith.constant 4 : i32
    %87 = arith.addi %1, %c4_i32_51 : i32
    %88 = arith.index_cast %86 : i32 to index
    %89 = arith.index_cast %87 : i32 to index
    %90 = memref.load %arg2[%88, %89] : memref<2x8xi32, #tpu.memory_space<smem>>
    %c0_i32_52 = arith.constant 0 : i32
    %91 = tpu.memref_slice %arg3[%90, %c0_i32_52] : memref<64x128xf32, #tpu.memory_space<any>> -> memref<1x128xf32, #tpu.memory_space<any>>
    %c12_i32 = arith.constant 12 : i32
    %c0_i32_53 = arith.constant 0 : i32
    %92 = tpu.memref_slice %arg6[%c12_i32, %c0_i32_53] : memref<16x128xf32, #tpu.memory_space<vmem>> -> memref<1x128xf32, #tpu.memory_space<vmem>>
    tpu.enqueue_dma source(%91 : memref<1x128xf32, #tpu.memory_space<any>>) target(%92 : memref<1x128xf32, #tpu.memory_space<vmem>>) target_semaphore(%arg7 : memref<!tpu.dma_semaphore, #tpu.memory_space<semaphore_mem>>)
    %c1_i32_54 = arith.constant 1 : i32
    %93 = arith.addi %0, %c1_i32_54 : i32
    %c5_i32_55 = arith.constant 5 : i32
    %94 = arith.addi %1, %c5_i32_55 : i32
    %95 = arith.index_cast %93 : i32 to index
    %96 = arith.index_cast %94 : i32 to index
    %97 = memref.load %arg2[%95, %96] : memref<2x8xi32, #tpu.memory_space<smem>>
    %c0_i32_56 = arith.constant 0 : i32
    %98 = tpu.memref_slice %arg3[%97, %c0_i32_56] : memref<64x128xf32, #tpu.memory_space<any>> -> memref<1x128xf32, #tpu.memory_space<any>>
    %c13_i32 = arith.constant 13 : i32
    %c0_i32_57 = arith.constant 0 : i32
    %99 = tpu.memref_slice %arg6[%c13_i32, %c0_i32_57] : memref<16x128xf32, #tpu.memory_space<vmem>> -> memref<1x128xf32, #tpu.memory_space<vmem>>
    tpu.enqueue_dma source(%98 : memref<1x128xf32, #tpu.memory_space<any>>) target(%99 : memref<1x128xf32, #tpu.memory_space<vmem>>) target_semaphore(%arg7 : memref<!tpu.dma_semaphore, #tpu.memory_space<semaphore_mem>>)
    %c1_i32_58 = arith.constant 1 : i32
    %100 = arith.addi %0, %c1_i32_58 : i32
    %c6_i32_59 = arith.constant 6 : i32
    %101 = arith.addi %1, %c6_i32_59 : i32
    %102 = arith.index_cast %100 : i32 to index
    %103 = arith.index_cast %101 : i32 to index
    %104 = memref.load %arg2[%102, %103] : memref<2x8xi32, #tpu.memory_space<smem>>
    %c0_i32_60 = arith.constant 0 : i32
    %105 = tpu.memref_slice %arg3[%104, %c0_i32_60] : memref<64x128xf32, #tpu.memory_space<any>> -> memref<1x128xf32, #tpu.memory_space<any>>
    %c14_i32 = arith.constant 14 : i32
    %c0_i32_61 = arith.constant 0 : i32
    %106 = tpu.memref_slice %arg6[%c14_i32, %c0_i32_61] : memref<16x128xf32, #tpu.memory_space<vmem>> -> memref<1x128xf32, #tpu.memory_space<vmem>>
    tpu.enqueue_dma source(%105 : memref<1x128xf32, #tpu.memory_space<any>>) target(%106 : memref<1x128xf32, #tpu.memory_space<vmem>>) target_semaphore(%arg7 : memref<!tpu.dma_semaphore, #tpu.memory_space<semaphore_mem>>)
    %c1_i32_62 = arith.constant 1 : i32
    %107 = arith.addi %0, %c1_i32_62 : i32
    %c7_i32_63 = arith.constant 7 : i32
    %108 = arith.addi %1, %c7_i32_63 : i32
    %109 = arith.index_cast %107 : i32 to index
    %110 = arith.index_cast %108 : i32 to index
    %111 = memref.load %arg2[%109, %110] : memref<2x8xi32, #tpu.memory_space<smem>>
    %c0_i32_64 = arith.constant 0 : i32
    %112 = tpu.memref_slice %arg3[%111, %c0_i32_64] : memref<64x128xf32, #tpu.memory_space<any>> -> memref<1x128xf32, #tpu.memory_space<any>>
    %c15_i32 = arith.constant 15 : i32
    %c0_i32_65 = arith.constant 0 : i32
    %113 = tpu.memref_slice %arg6[%c15_i32, %c0_i32_65] : memref<16x128xf32, #tpu.memory_space<vmem>> -> memref<1x128xf32, #tpu.memory_space<vmem>>
    tpu.enqueue_dma source(%112 : memref<1x128xf32, #tpu.memory_space<any>>) target(%113 : memref<1x128xf32, #tpu.memory_space<vmem>>) target_semaphore(%arg7 : memref<!tpu.dma_semaphore, #tpu.memory_space<semaphore_mem>>)
    %c0_i32_66 = arith.constant 0 : i32
    %114 = tpu.memref_slice %arg3[%6, %c0_i32_66] : memref<64x128xf32, #tpu.memory_space<any>> -> memref<1x128xf32, #tpu.memory_space<any>>
    %c0_i32_67 = arith.constant 0 : i32
    %c0_i32_68 = arith.constant 0 : i32
    %115 = tpu.memref_slice %arg6[%c0_i32_67, %c0_i32_68] : memref<16x128xf32, #tpu.memory_space<vmem>> -> memref<1x128xf32, #tpu.memory_space<vmem>>
    tpu.wait_dma2 semaphore(%arg7 : memref<!tpu.dma_semaphore, #tpu.memory_space<semaphore_mem>>) src(%114 : memref<1x128xf32, #tpu.memory_space<any>>) dst(%115 : memref<1x128xf32, #tpu.memory_space<vmem>>)
    %c0_i32_69 = arith.constant 0 : i32
    %116 = tpu.memref_slice %arg3[%13, %c0_i32_69] : memref<64x128xf32, #tpu.memory_space<any>> -> memref<1x128xf32, #tpu.memory_space<any>>
    %c1_i32_70 = arith.constant 1 : i32
    %c0_i32_71 = arith.constant 0 : i32
    %117 = tpu.memref_slice %arg6[%c1_i32_70, %c0_i32_71] : memref<16x128xf32, #tpu.memory_space<vmem>> -> memref<1x128xf32, #tpu.memory_space<vmem>>
    tpu.wait_dma2 semaphore(%arg7 : memref<!tpu.dma_semaphore, #tpu.memory_space<semaphore_mem>>) src(%116 : memref<1x128xf32, #tpu.memory_space<any>>) dst(%117 : memref<1x128xf32, #tpu.memory_space<vmem>>)
    %c0_i32_72 = arith.constant 0 : i32
    %118 = tpu.memref_slice %arg3[%20, %c0_i32_72] : memref<64x128xf32, #tpu.memory_space<any>> -> memref<1x128xf32, #tpu.memory_space<any>>
    %c2_i32_73 = arith.constant 2 : i32
    %c0_i32_74 = arith.constant 0 : i32
    %119 = tpu.memref_slice %arg6[%c2_i32_73, %c0_i32_74] : memref<16x128xf32, #tpu.memory_space<vmem>> -> memref<1x128xf32, #tpu.memory_space<vmem>>
    tpu.wait_dma2 semaphore(%arg7 : memref<!tpu.dma_semaphore, #tpu.memory_space<semaphore_mem>>) src(%118 : memref<1x128xf32, #tpu.memory_space<any>>) dst(%119 : memref<1x128xf32, #tpu.memory_space<vmem>>)
    %c0_i32_75 = arith.constant 0 : i32
    %120 = tpu.memref_slice %arg3[%27, %c0_i32_75] : memref<64x128xf32, #tpu.memory_space<any>> -> memref<1x128xf32, #tpu.memory_space<any>>
    %c3_i32_76 = arith.constant 3 : i32
    %c0_i32_77 = arith.constant 0 : i32
    %121 = tpu.memref_slice %arg6[%c3_i32_76, %c0_i32_77] : memref<16x128xf32, #tpu.memory_space<vmem>> -> memref<1x128xf32, #tpu.memory_space<vmem>>
    tpu.wait_dma2 semaphore(%arg7 : memref<!tpu.dma_semaphore, #tpu.memory_space<semaphore_mem>>) src(%120 : memref<1x128xf32, #tpu.memory_space<any>>) dst(%121 : memref<1x128xf32, #tpu.memory_space<vmem>>)
    %c0_i32_78 = arith.constant 0 : i32
    %122 = tpu.memref_slice %arg3[%34, %c0_i32_78] : memref<64x128xf32, #tpu.memory_space<any>> -> memref<1x128xf32, #tpu.memory_space<any>>
    %c4_i32_79 = arith.constant 4 : i32
    %c0_i32_80 = arith.constant 0 : i32
    %123 = tpu.memref_slice %arg6[%c4_i32_79, %c0_i32_80] : memref<16x128xf32, #tpu.memory_space<vmem>> -> memref<1x128xf32, #tpu.memory_space<vmem>>
    tpu.wait_dma2 semaphore(%arg7 : memref<!tpu.dma_semaphore, #tpu.memory_space<semaphore_mem>>) src(%122 : memref<1x128xf32, #tpu.memory_space<any>>) dst(%123 : memref<1x128xf32, #tpu.memory_space<vmem>>)
    %c0_i32_81 = arith.constant 0 : i32
    %124 = tpu.memref_slice %arg3[%41, %c0_i32_81] : memref<64x128xf32, #tpu.memory_space<any>> -> memref<1x128xf32, #tpu.memory_space<any>>
    %c5_i32_82 = arith.constant 5 : i32
    %c0_i32_83 = arith.constant 0 : i32
    %125 = tpu.memref_slice %arg6[%c5_i32_82, %c0_i32_83] : memref<16x128xf32, #tpu.memory_space<vmem>> -> memref<1x128xf32, #tpu.memory_space<vmem>>
    tpu.wait_dma2 semaphore(%arg7 : memref<!tpu.dma_semaphore, #tpu.memory_space<semaphore_mem>>) src(%124 : memref<1x128xf32, #tpu.memory_space<any>>) dst(%125 : memref<1x128xf32, #tpu.memory_space<vmem>>)
    %c0_i32_84 = arith.constant 0 : i32
    %126 = tpu.memref_slice %arg3[%48, %c0_i32_84] : memref<64x128xf32, #tpu.memory_space<any>> -> memref<1x128xf32, #tpu.memory_space<any>>
    %c6_i32_85 = arith.constant 6 : i32
    %c0_i32_86 = arith.constant 0 : i32
    %127 = tpu.memref_slice %arg6[%c6_i32_85, %c0_i32_86] : memref<16x128xf32, #tpu.memory_space<vmem>> -> memref<1x128xf32, #tpu.memory_space<vmem>>
    tpu.wait_dma2 semaphore(%arg7 : memref<!tpu.dma_semaphore, #tpu.memory_space<semaphore_mem>>) src(%126 : memref<1x128xf32, #tpu.memory_space<any>>) dst(%127 : memref<1x128xf32, #tpu.memory_space<vmem>>)
    %c0_i32_87 = arith.constant 0 : i32
    %128 = tpu.memref_slice %arg3[%55, %c0_i32_87] : memref<64x128xf32, #tpu.memory_space<any>> -> memref<1x128xf32, #tpu.memory_space<any>>
    %c7_i32_88 = arith.constant 7 : i32
    %c0_i32_89 = arith.constant 0 : i32
    %129 = tpu.memref_slice %arg6[%c7_i32_88, %c0_i32_89] : memref<16x128xf32, #tpu.memory_space<vmem>> -> memref<1x128xf32, #tpu.memory_space<vmem>>
    tpu.wait_dma2 semaphore(%arg7 : memref<!tpu.dma_semaphore, #tpu.memory_space<semaphore_mem>>) src(%128 : memref<1x128xf32, #tpu.memory_space<any>>) dst(%129 : memref<1x128xf32, #tpu.memory_space<vmem>>)
    %c0_i32_90 = arith.constant 0 : i32
    %130 = tpu.memref_slice %arg3[%62, %c0_i32_90] : memref<64x128xf32, #tpu.memory_space<any>> -> memref<1x128xf32, #tpu.memory_space<any>>
    %c8_i32_91 = arith.constant 8 : i32
    %c0_i32_92 = arith.constant 0 : i32
    %131 = tpu.memref_slice %arg6[%c8_i32_91, %c0_i32_92] : memref<16x128xf32, #tpu.memory_space<vmem>> -> memref<1x128xf32, #tpu.memory_space<vmem>>
    tpu.wait_dma2 semaphore(%arg7 : memref<!tpu.dma_semaphore, #tpu.memory_space<semaphore_mem>>) src(%130 : memref<1x128xf32, #tpu.memory_space<any>>) dst(%131 : memref<1x128xf32, #tpu.memory_space<vmem>>)
    %c0_i32_93 = arith.constant 0 : i32
    %132 = tpu.memref_slice %arg3[%69, %c0_i32_93] : memref<64x128xf32, #tpu.memory_space<any>> -> memref<1x128xf32, #tpu.memory_space<any>>
    %c9_i32_94 = arith.constant 9 : i32
    %c0_i32_95 = arith.constant 0 : i32
    %133 = tpu.memref_slice %arg6[%c9_i32_94, %c0_i32_95] : memref<16x128xf32, #tpu.memory_space<vmem>> -> memref<1x128xf32, #tpu.memory_space<vmem>>
    tpu.wait_dma2 semaphore(%arg7 : memref<!tpu.dma_semaphore, #tpu.memory_space<semaphore_mem>>) src(%132 : memref<1x128xf32, #tpu.memory_space<any>>) dst(%133 : memref<1x128xf32, #tpu.memory_space<vmem>>)
    %c0_i32_96 = arith.constant 0 : i32
    %134 = tpu.memref_slice %arg3[%76, %c0_i32_96] : memref<64x128xf32, #tpu.memory_space<any>> -> memref<1x128xf32, #tpu.memory_space<any>>
    %c10_i32_97 = arith.constant 10 : i32
    %c0_i32_98 = arith.constant 0 : i32
    %135 = tpu.memref_slice %arg6[%c10_i32_97, %c0_i32_98] : memref<16x128xf32, #tpu.memory_space<vmem>> -> memref<1x128xf32, #tpu.memory_space<vmem>>
    tpu.wait_dma2 semaphore(%arg7 : memref<!tpu.dma_semaphore, #tpu.memory_space<semaphore_mem>>) src(%134 : memref<1x128xf32, #tpu.memory_space<any>>) dst(%135 : memref<1x128xf32, #tpu.memory_space<vmem>>)
    %c0_i32_99 = arith.constant 0 : i32
    %136 = tpu.memref_slice %arg3[%83, %c0_i32_99] : memref<64x128xf32, #tpu.memory_space<any>> -> memref<1x128xf32, #tpu.memory_space<any>>
    %c11_i32_100 = arith.constant 11 : i32
    %c0_i32_101 = arith.constant 0 : i32
    %137 = tpu.memref_slice %arg6[%c11_i32_100, %c0_i32_101] : memref<16x128xf32, #tpu.memory_space<vmem>> -> memref<1x128xf32, #tpu.memory_space<vmem>>
    tpu.wait_dma2 semaphore(%arg7 : memref<!tpu.dma_semaphore, #tpu.memory_space<semaphore_mem>>) src(%136 : memref<1x128xf32, #tpu.memory_space<any>>) dst(%137 : memref<1x128xf32, #tpu.memory_space<vmem>>)
    %c0_i32_102 = arith.constant 0 : i32
    %138 = tpu.memref_slice %arg3[%90, %c0_i32_102] : memref<64x128xf32, #tpu.memory_space<any>> -> memref<1x128xf32, #tpu.memory_space<any>>
    %c12_i32_103 = arith.constant 12 : i32
    %c0_i32_104 = arith.constant 0 : i32
    %139 = tpu.memref_slice %arg6[%c12_i32_103, %c0_i32_104] : memref<16x128xf32, #tpu.memory_space<vmem>> -> memref<1x128xf32, #tpu.memory_space<vmem>>
    tpu.wait_dma2 semaphore(%arg7 : memref<!tpu.dma_semaphore, #tpu.memory_space<semaphore_mem>>) src(%138 : memref<1x128xf32, #tpu.memory_space<any>>) dst(%139 : memref<1x128xf32, #tpu.memory_space<vmem>>)
    %c0_i32_105 = arith.constant 0 : i32
    %140 = tpu.memref_slice %arg3[%97, %c0_i32_105] : memref<64x128xf32, #tpu.memory_space<any>> -> memref<1x128xf32, #tpu.memory_space<any>>
    %c13_i32_106 = arith.constant 13 : i32
    %c0_i32_107 = arith.constant 0 : i32
    %141 = tpu.memref_slice %arg6[%c13_i32_106, %c0_i32_107] : memref<16x128xf32, #tpu.memory_space<vmem>> -> memref<1x128xf32, #tpu.memory_space<vmem>>
    tpu.wait_dma2 semaphore(%arg7 : memref<!tpu.dma_semaphore, #tpu.memory_space<semaphore_mem>>) src(%140 : memref<1x128xf32, #tpu.memory_space<any>>) dst(%141 : memref<1x128xf32, #tpu.memory_space<vmem>>)
    %c0_i32_108 = arith.constant 0 : i32
    %142 = tpu.memref_slice %arg3[%104, %c0_i32_108] : memref<64x128xf32, #tpu.memory_space<any>> -> memref<1x128xf32, #tpu.memory_space<any>>
    %c14_i32_109 = arith.constant 14 : i32
    %c0_i32_110 = arith.constant 0 : i32
    %143 = tpu.memref_slice %arg6[%c14_i32_109, %c0_i32_110] : memref<16x128xf32, #tpu.memory_space<vmem>> -> memref<1x128xf32, #tpu.memory_space<vmem>>
    tpu.wait_dma2 semaphore(%arg7 : memref<!tpu.dma_semaphore, #tpu.memory_space<semaphore_mem>>) src(%142 : memref<1x128xf32, #tpu.memory_space<any>>) dst(%143 : memref<1x128xf32, #tpu.memory_space<vmem>>)
    %c0_i32_111 = arith.constant 0 : i32
    %144 = tpu.memref_slice %arg3[%111, %c0_i32_111] : memref<64x128xf32, #tpu.memory_space<any>> -> memref<1x128xf32, #tpu.memory_space<any>>
    %c15_i32_112 = arith.constant 15 : i32
    %c0_i32_113 = arith.constant 0 : i32
    %145 = tpu.memref_slice %arg6[%c15_i32_112, %c0_i32_113] : memref<16x128xf32, #tpu.memory_space<vmem>> -> memref<1x128xf32, #tpu.memory_space<vmem>>
    tpu.wait_dma2 semaphore(%arg7 : memref<!tpu.dma_semaphore, #tpu.memory_space<semaphore_mem>>) src(%144 : memref<1x128xf32, #tpu.memory_space<any>>) dst(%145 : memref<1x128xf32, #tpu.memory_space<vmem>>)
    %c0 = arith.constant 0 : index
    %c0_114 = arith.constant 0 : index
    %146 = vector.load %arg4[%c0, %c0_114] : memref<8x128xf32, #tpu.memory_space<vmem>>, vector<8x128xf32>
    %c0_115 = arith.constant 0 : index
    %c0_116 = arith.constant 0 : index
    %147 = vector.load %arg6[%c0_115, %c0_116] : memref<16x128xf32, #tpu.memory_space<vmem>>, vector<8x128xf32>
    %148 = arith.addf %147, %146 : vector<8x128xf32>
    %c0_117 = arith.constant 0 : index
    %c0_118 = arith.constant 0 : index
    %c0_119 = arith.constant 0 : index
    %149 = vector.load %arg5[%c0_117, %c0_118, %c0_119] : memref<2x8x128xf32, #tpu.memory_space<vmem>>, vector<1x8x128xf32>
    %150 = vector.shape_cast %149 : vector<1x8x128xf32> to vector<8x128xf32>
    %151 = vector.shape_cast %148 : vector<8x128xf32> to vector<1x8x128xf32>
    tpu.vector_store %arg5[%c0_117, %c0_118, %c0_119], %151 {strides = array<i32>} : memref<2x8x128xf32, #tpu.memory_space<vmem>>, vector<1x8x128xf32>,
    %c8 = arith.constant 8 : index
    %c0_120 = arith.constant 0 : index
    %152 = vector.load %arg6[%c8, %c0_120] : memref<16x128xf32, #tpu.memory_space<vmem>>, vector<8x128xf32>
    %153 = arith.addf %152, %146 : vector<8x128xf32>
    %c1 = arith.constant 1 : index
    %c0_121 = arith.constant 0 : index
    %c0_122 = arith.constant 0 : index
    %154 = vector.load %arg5[%c1, %c0_121, %c0_122] : memref<2x8x128xf32, #tpu.memory_space<vmem>>, vector<1x8x128xf32>
    %155 = vector.shape_cast %154 : vector<1x8x128xf32> to vector<8x128xf32>
    %156 = vector.shape_cast %153 : vector<8x128xf32> to vector<1x8x128xf32>
    tpu.vector_store %arg5[%c1, %c0_121, %c0_122], %156 {strides = array<i32>} : memref<2x8x128xf32, #tpu.memory_space<vmem>>, vector<1x8x128xf32>,
    return
  }
  func.func @transform_1(%arg0: i32, %arg1: i32, %arg2: memref<2x8xi32, #tpu.memory_space<smem>>) -> (i32, i32) {
    %c0_i32 = arith.constant 0 : i32
    %c0_i32_0 = arith.constant 0 : i32
    %c0_i32_1 = arith.constant 0 : i32
    return %c0_i32, %c0_i32_0 : i32, i32
  }
  func.func @transform_2(%arg0: i32, %arg1: i32, %arg2: memref<2x8xi32, #tpu.memory_space<smem>>) -> (i32, i32, i32) {
    %c0_i32 = arith.constant 0 : i32
    %c0_i32_0 = arith.constant 0 : i32
    return %arg0, %arg1, %c0_i32 : i32, i32, i32
  }
}

</mosaic_0001>

<bundles_post_ra>
// kernel: tpu_custom_call.1
= control target key start
LH: loop header
LB: loop body
LE: loop exit
PB: predicated region body
PF: predicated region fallthrough
CT: control target
= control target key end

     0   :  { %s949_s15 = smov [#allocation5]   ;;  %s1173_s0 = inlined_call_operand.hbm [shape: s32[2,8], index: 0, kind: input, shape index: {}]   ;;  %s1174_s1 = inlined_call_operand.hbm [shape: f32[64,128], index: 1, kind: input, shape index: {}]   ;;  %s1175_s2 = inlined_call_operand.hbm [shape: f32[8,128], index: 2, kind: input, shape index: {}]   ;;  %s1176_s3 = inlined_call_operand.hbm [shape: f32[2,8,128], index: 3, kind: output, shape index: {}]  }
   0x1   :  { %s9_s14 = sshll.u32 %s1173_s0, 4  ;;  %s10_s14 = int_to_ptr.hbm [resolvable:$true] %s9_s14 }
   0x2   :  { %12 = dma.hbm_to_smem %s10_s14, 32, %s949_s15, [#allocation4] }
   0x3   :  { %941 = dma.done.wait [#allocation4], 32 }
   0x4   :  { %942 = vsyncadd [#allocation4], 4294967264 }
   0x5   :  { %15 = sfence }
   0x6   :  { %16 = vsyncpa [#allocation7], 0 }
   0x7   :  { %17 = vsyncpa [#allocation8], 0  ;;  %s23_s18 = sshll.u32 %s1175_s2, 4  ;;  %s950_s19 = smov [#allocation6]   ;;  %s24_s18 = int_to_ptr.hbm [resolvable:$true] %s23_s18 }
   0x8   :  { %s25_s20 = sshll.u32 %s950_s19, 4  ;;  %s26_s20 = int_to_ptr.vmem [resolvable:$true] %s25_s20 }
   0x9   :  { %28 = dma.hbm_to_vmem [thread:$0]  %s24_s18, 128, %s26_s20, [#allocation7]  }
   0xa   :  { %943 = dma.done.wait [#allocation7], 128  }
   0xb   :  { %944 = vsyncadd [#allocation7], 4294967168  ;;  %s42_s0 = sld [smem:[#allocation5]]  ;;  %s951_s21 = smov [#allocation2]  }
   0xc   :  { %s996_s22 = sshll.u32 %s951_s21, 4  ;;  %s460_s23 = sld [smem:[#allocation5 + $0x1]]  ;;  %s54_s22 = int_to_ptr.vmem [resolvable:$true] %s996_s22 }
   0xd   :  { %s952_s24 = smov [#allocation2 + $0x1]   ;;  %s1001_s26 = sld [smem:[#allocation5 + $0x2]] }
   0xe   :  { %s999_s25 = sshll.u32 %s952_s24, 4  ;;  %s953_s2 = smov [#allocation2 + $0x2]   ;;  %s78_s25 = int_to_ptr.vmem [resolvable:$true] %s999_s25 }
   0xf   :  { %s1004_s27 = sshll.u32 %s953_s2, 4  ;;  %s1006_s28 = sld [smem:[#allocation5 + $0x3]]  ;;  %s102_s27 = int_to_ptr.vmem [resolvable:$true] %s1004_s27 }
  0x10   :  { %s954_s5 = smov [#allocation2 + $0x3]   ;;  %s1020_s16 = scalar_lea.hbm %s1174_s1, 64 }
  0x11   :  { %s43_s4 = scalar_lea.hbm %s1174_s1, %s42_s0  ;;  %s1012_s6 = sshll.u32 %s954_s5, 4  ;;  %s126_s6 = int_to_ptr.vmem [resolvable:$true] %s1012_s6 }
  0x12   :  { %s51_s7 = sshll.u32 %s43_s4, 4  ;;  %s66_s10 = scalar_lea.hbm %s1174_s1, %s460_s23  ;;  %s52_s7 = int_to_ptr.hbm [resolvable:$true] %s51_s7 }
  0x13   :  { %s75_s11 = sshll.u32 %s66_s10, 4  ;;  %s533_s12 = sshra.s32 %s52_s7, 4  ;;  %s534_s12 = int_to_ptr.hbm [resolvable:$true] %s533_s12  ;;  %s76_s11 = int_to_ptr.hbm [resolvable:$true] %s75_s11 }
  0x14   :  { %s535_s13 = scalar_lea.hbm %s534_s12, 1  ;;  %p538_p1 = scmp.lt.s32.totalorder %s534_s12, %s1174_s1 }
  0x15   :  { %p536_p0 = scmp.ne.s32.totalorder %s534_s12, %s535_s13  ;;  %p539_p2 = scmp.lt.s32.totalorder %s1020_s16, %s535_s13 }
  0x17   :  { %p540_p3 = por %p539_p2, %p538_p1 }
  0x19   :  { %p541_p4 = pnand %p540_p3, %p536_p0 }
  0x1b   :  { %544 = shalt.err (!%p541_p4)  }
  0x1c   :  { %56 = dma.hbm_to_vmem [thread:$0]  %s52_s7, 16, %s54_s22, [#allocation3] }
  0x1d   :  { %s90_s0 = scalar_lea.hbm %s1174_s1, %s1001_s26  ;;  %s557_s21 = sshra.s32 %s76_s11, 4  ;;  %s558_s21 = int_to_ptr.hbm [resolvable:$true] %s557_s21 }
  0x1e   :  { %s559_s23 = scalar_lea.hbm %s558_s21, 1  ;;  %p562_p6 = scmp.lt.s32.totalorder %s558_s21, %s1174_s1 }
  0x1f   :  { %p560_p5 = scmp.ne.s32.totalorder %s558_s21, %s559_s23  ;;  %p563_p7 = scmp.lt.s32.totalorder %s1020_s16, %s559_s23 }
  0x21   :  { %p564_p8 = por %p563_p7, %p562_p6 }
  0x23   :  { %p565_p9 = pnand %p564_p8, %p560_p5 }
  0x25   :  { %568 = shalt.err (!%p565_p9)  }
  0x26   :  { %80 = dma.hbm_to_vmem [thread:$0]  %s76_s11, 16, %s78_s25, [#allocation3] }
  0x27   :  { %s99_s22 = sshll.u32 %s90_s0, 4  ;;  %s114_s30 = scalar_lea.hbm %s1174_s1, %s1006_s28  ;;  %s100_s22 = int_to_ptr.hbm [resolvable:$true] %s99_s22 }
  0x28   :  { %s123_s4 = sshll.u32 %s114_s30, 4  ;;  %s581_s5 = sshra.s32 %s100_s22, 4  ;;  %s582_s5 = int_to_ptr.hbm [resolvable:$true] %s581_s5  ;;  %s124_s4 = int_to_ptr.hbm [resolvable:$true] %s123_s4 }
  0x29   :  { %s583_s7 = scalar_lea.hbm %s582_s5, 1  ;;  %p586_p11 = scmp.lt.s32.totalorder %s582_s5, %s1174_s1 }
  0x2a   :  { %p584_p10 = scmp.ne.s32.totalorder %s582_s5, %s583_s7  ;;  %p587_p12 = scmp.lt.s32.totalorder %s1020_s16, %s583_s7 }
  0x2c   :  { %p588_p13 = por %p587_p12, %p586_p11 }
  0x2e   :  { %p589_p0 = pnand %p588_p13, %p584_p10 }
  0x30   :  { %592 = shalt.err (!%p589_p0)  }
  0x31   :  { %104 = dma.hbm_to_vmem [thread:$0]  %s100_s22, 16, %s102_s27, [#allocation3] }
  0x32   :  { %s605_s25 = sshra.s32 %s124_s4, 4  ;;  %s606_s25 = int_to_ptr.hbm [resolvable:$true] %s605_s25 }
  0x33   :  { %s607_s28 = scalar_lea.hbm %s606_s25, 1  ;;  %p610_p2 = scmp.lt.s32.totalorder %s606_s25, %s1174_s1 }
  0x34   :  { %p608_p1 = scmp.ne.s32.totalorder %s606_s25, %s607_s28  ;;  %p611_p3 = scmp.lt.s32.totalorder %s1020_s16, %s607_s28 }
  0x36   :  { %p612_p4 = por %p611_p3, %p610_p2 }
  0x38   :  { %p613_p5 = pnand %p612_p4, %p608_p1 }
  0x3a   :  { %616 = shalt.err (!%p613_p5)  }
  0x3b   :  { %128 = dma.hbm_to_vmem [thread:$0]  %s124_s4, 16, %s126_s6, [#allocation3] }
  0x3c   :  { %s463_s12 = sld [smem:[#allocation5 + $0x4]]  ;;  %s955_s13 = smov [#allocation2 + $0x4]  }
  0x3d   :  { %s149_s14 = sshll.u32 %s955_s13, 4  ;;  %s464_s15 = sld [smem:[#allocation5 + $0x5]]  ;;  %s150_s14 = int_to_ptr.vmem [resolvable:$true] %s149_s14 }
  0x3e   :  { %s956_s27 = smov [#allocation2 + $0x5]   ;;  %s1053_s18 = sld [smem:[#allocation5 + $0x6]] }
  0x3f   :  { %s1051_s17 = sshll.u32 %s956_s27, 4  ;;  %s957_s19 = smov [#allocation2 + $0x6]   ;;  %s174_s17 = int_to_ptr.vmem [resolvable:$true] %s1051_s17 }
  0x40   :  { %s1056_s20 = sshll.u32 %s957_s19, 4  ;;  %s1058_s0 = sld [smem:[#allocation5 + $0x7]]  ;;  %s198_s20 = int_to_ptr.vmem [resolvable:$true] %s1056_s20 }
  0x42   :  { %s138_s23 = scalar_lea.hbm %s1174_s1, %s463_s12 }
  0x43   :  { %s147_s24 = sshll.u32 %s138_s23, 4  ;;  %s162_s29 = scalar_lea.hbm %s1174_s1, %s464_s15  ;;  %s148_s24 = int_to_ptr.hbm [resolvable:$true] %s147_s24 }
  0x44   :  { %s171_s26 = sshll.u32 %s162_s29, 4  ;;  %s629_s30 = sshra.s32 %s148_s24, 4  ;;  %s630_s30 = int_to_ptr.hbm [resolvable:$true] %s629_s30  ;;  %s172_s26 = int_to_ptr.hbm [resolvable:$true] %s171_s26 }
  0x45   :  { %s631_s4 = scalar_lea.hbm %s630_s30, 1  ;;  %p634_p7 = scmp.lt.s32.totalorder %s630_s30, %s1174_s1 }
  0x46   :  { %p632_p6 = scmp.ne.s32.totalorder %s630_s30, %s631_s4  ;;  %p635_p8 = scmp.lt.s32.totalorder %s1020_s16, %s631_s4 }
  0x48   :  { %p636_p9 = por %p635_p8, %p634_p7 }
  0x4a   :  { %p637_p10 = pnand %p636_p9, %p632_p6 }
  0x4c   :  { %640 = shalt.err (!%p637_p10)  }
  0x4d   :  { %152 = dma.hbm_to_vmem [thread:$0]  %s148_s24, 16, %s150_s14, [#allocation3] }
  0x4e   :  { %s186_s25 = scalar_lea.hbm %s1174_s1, %s1053_s18  ;;  %s653_s28 = sshra.s32 %s172_s26, 4  ;;  %s654_s28 = int_to_ptr.hbm [resolvable:$true] %s653_s28 }
  0x4f   :  { %s655_s10 = scalar_lea.hbm %s654_s28, 1  ;;  %p658_p12 = scmp.lt.s32.totalorder %s654_s28, %s1174_s1 }
  0x50   :  { %p656_p11 = scmp.ne.s32.totalorder %s654_s28, %s655_s10  ;;  %p659_p13 = scmp.lt.s32.totalorder %s1020_s16, %s655_s10 }
  0x52   :  { %p660_p0 = por %p659_p13, %p658_p12 }
  0x54   :  { %p661_p1 = pnand %p660_p0, %p656_p11 }
  0x56   :  { %664 = shalt.err (!%p661_p1)  }
  0x57   :  { %176 = dma.hbm_to_vmem [thread:$0]  %s172_s26, 16, %s174_s17, [#allocation3] }
  0x58   :  { %s195_s13 = sshll.u32 %s186_s25, 4  ;;  %s210_s27 = scalar_lea.hbm %s1174_s1, %s1058_s0  ;;  %s196_s13 = int_to_ptr.hbm [resolvable:$true] %s195_s13 }
  0x59   :  { %s219_s18 = sshll.u32 %s210_s27, 4  ;;  %s677_s19 = sshra.s32 %s196_s13, 4  ;;  %s678_s19 = int_to_ptr.hbm [resolvable:$true] %s677_s19  ;;  %s220_s18 = int_to_ptr.hbm [resolvable:$true] %s219_s18 }
  0x5a   :  { %s679_s6 = scalar_lea.hbm %s678_s19, 1  ;;  %p682_p3 = scmp.lt.s32.totalorder %s678_s19, %s1174_s1 }
  0x5b   :  { %p680_p2 = scmp.ne.s32.totalorder %s678_s19, %s679_s6  ;;  %p683_p4 = scmp.lt.s32.totalorder %s1020_s16, %s679_s6 }
  0x5d   :  { %p684_p5 = por %p683_p4, %p682_p3 }
  0x5f   :  { %p685_p6 = pnand %p684_p5, %p680_p2 }
  0x61   :  { %688 = shalt.err (!%p685_p6)  }
  0x62   :  { %200 = dma.hbm_to_vmem [thread:$0]  %s196_s13, 16, %s198_s20, [#allocation3] }
  0x63   :  { %s958_s17 = smov [#allocation2 + $0x7]   ;;  %s467_s24 = sld [smem:[#allocation5 + $0x80]] }
  0x64   :  { %s221_s0 = sshll.u32 %s958_s17, 4  ;;  %s701_s2 = sshra.s32 %s220_s18, 4  ;;  %s222_s0 = int_to_ptr.vmem [resolvable:$true] %s221_s0  ;;  %s702_s2 = int_to_ptr.hbm [resolvable:$true] %s701_s2 }
  0x65   :  { %s703_s22 = scalar_lea.hbm %s702_s2, 1  ;;  %p706_p8 = scmp.lt.s32.totalorder %s702_s2, %s1174_s1 }
  0x66   :  { %p704_p7 = scmp.ne.s32.totalorder %s702_s2, %s703_s22  ;;  %p707_p9 = scmp.lt.s32.totalorder %s1020_s16, %s703_s22 }
  0x68   :  { %p708_p10 = por %p707_p9, %p706_p8 }
  0x6a   :  { %p709_p11 = pnand %p708_p10, %p704_p7 }
  0x6c   :  { %712 = shalt.err (!%p709_p11)  }
  0x6d   :  { %224 = dma.hbm_to_vmem [thread:$0]  %s220_s18, 16, %s222_s0, [#allocation3] }
  0x6e   :  { %s959_s30 = smov [#allocation2 + $0x8]   ;;  %s468_s4 = sld [smem:[#allocation5 + $0x81]] }
  0x6f   :  { %s241_s20 = sshll.u32 %s959_s30, 4  ;;  %s960_s5 = smov [#allocation2 + $0x9]   ;;  %s242_s20 = int_to_ptr.vmem [resolvable:$true] %s241_s20 }
  0x70   :  { %s1095_s7 = sshll.u32 %s960_s5, 4  ;;  %s469_s8 = sld [smem:[#allocation5 + $0x82]]  ;;  %s261_s7 = int_to_ptr.vmem [resolvable:$true] %s1095_s7 }
  0x71   :  { %s230_s28 = scalar_lea.hbm %s1174_s1, %s467_s24  ;;  %s961_s11 = smov [#allocation2 + $0xa]  }
  0x72   :  { %s239_s10 = sshll.u32 %s230_s28, 4  ;;  %s1101_s12 = sshll.u32 %s961_s11, 4  ;;  %s240_s10 = int_to_ptr.hbm [resolvable:$true] %s239_s10  ;;  %s280_s12 = int_to_ptr.vmem [resolvable:$true] %s1101_s12 }
  0x73   :  { %s725_s13 = sshra.s32 %s240_s10, 4  ;;  %s726_s13 = int_to_ptr.hbm [resolvable:$true] %s725_s13 }
  0x74   :  { %s727_s14 = scalar_lea.hbm %s726_s13, 1  ;;  %p730_p13 = scmp.lt.s32.totalorder %s726_s13, %s1174_s1 }
  0x75   :  { %p728_p12 = scmp.ne.s32.totalorder %s726_s13, %s727_s14  ;;  %p731_p0 = scmp.lt.s32.totalorder %s1020_s16, %s727_s14 }
  0x77   :  { %p732_p1 = por %p731_p0, %p730_p13 }
  0x79   :  { %p733_p2 = pnand %p732_p1, %p728_p12 }
  0x7b   :  { %736 = shalt.err (!%p733_p2)  }
  0x7c   :  { %244 = dma.hbm_to_vmem [thread:$0]  %s240_s10, 16, %s242_s20, [#allocation3] }
  0x7d   :  { %s249_s6 = scalar_lea.hbm %s1174_s1, %s468_s4  ;;  %s268_s0 = scalar_lea.hbm %s1174_s1, %s469_s8 }
  0x7e   :  { %s258_s21 = sshll.u32 %s249_s6, 4  ;;  %s277_s24 = sshll.u32 %s268_s0, 4  ;;  %s259_s21 = int_to_ptr.hbm [resolvable:$true] %s258_s21  ;;  %s278_s24 = int_to_ptr.hbm [resolvable:$true] %s277_s24 }
  0x7f   :  { %s749_s2 = sshra.s32 %s259_s21, 4  ;;  %s750_s2 = int_to_ptr.hbm [resolvable:$true] %s749_s2 }
  0x80   :  { %s751_s22 = scalar_lea.hbm %s750_s2, 1  ;;  %p754_p4 = scmp.lt.s32.totalorder %s750_s2, %s1174_s1 }
  0x81   :  { %p752_p3 = scmp.ne.s32.totalorder %s750_s2, %s751_s22  ;;  %p755_p5 = scmp.lt.s32.totalorder %s1020_s16, %s751_s22 }
  0x83   :  { %p756_p6 = por %p755_p5, %p754_p4 }
  0x85   :  { %p757_p7 = pnand %p756_p6, %p752_p3 }
  0x87   :  { %760 = shalt.err (!%p757_p7)  }
  0x88   :  { %263 = dma.hbm_to_vmem [thread:$0]  %s259_s21, 16, %s261_s7, [#allocation3] }
  0x89   :  { %s470_s30 = sld [smem:[#allocation5 + $0x83]]  ;;  %s773_s20 = sshra.s32 %s278_s24, 4  ;;  %s774_s20 = int_to_ptr.hbm [resolvable:$true] %s773_s20 }
  0x8a   :  { %s775_s4 = scalar_lea.hbm %s774_s20, 1  ;;  %p778_p9 = scmp.lt.s32.totalorder %s774_s20, %s1174_s1 }
  0x8b   :  { %p776_p8 = scmp.ne.s32.totalorder %s774_s20, %s775_s4  ;;  %p779_p10 = scmp.lt.s32.totalorder %s1020_s16, %s775_s4 }
  0x8d   :  { %p780_p11 = por %p779_p10, %p778_p9 }
  0x8f   :  { %p781_p12 = pnand %p780_p11, %p776_p8 }
  0x91   :  { %784 = shalt.err (!%p781_p12)  }
  0x92   :  { %282 = dma.hbm_to_vmem [thread:$0]  %s278_s24, 16, %s280_s12, [#allocation3] }
  0x93   :  { %s471_s9 = sld [smem:[#allocation5 + $0x84]]  ;;  %s962_s25 = smov [#allocation2 + $0xb]  }
  0x94   :  { %s298_s28 = sshll.u32 %s962_s25, 4  ;;  %s963_s7 = smov [#allocation2 + $0xc]   ;;  %s299_s28 = int_to_ptr.vmem [resolvable:$true] %s298_s28 }
  0x95   :  { %s1124_s10 = sshll.u32 %s963_s7, 4  ;;  %s1127_s11 = sld [smem:[#allocation5 + $0x85]]  ;;  %s318_s10 = int_to_ptr.vmem [resolvable:$true] %s1124_s10 }
  0x96   :  { %s287_s15 = scalar_lea.hbm %s1174_s1, %s470_s30  ;;  %s964_s18 = smov [#allocation2 + $0xd]  }
  0x97   :  { %s296_s27 = sshll.u32 %s287_s15, 4  ;;  %s1132_s19 = sshll.u32 %s964_s18, 4  ;;  %s297_s27 = int_to_ptr.hbm [resolvable:$true] %s296_s27  ;;  %s337_s19 = int_to_ptr.vmem [resolvable:$true] %s1132_s19 }
  0x98   :  { %s797_s23 = sshra.s32 %s297_s27, 4  ;;  %s798_s23 = int_to_ptr.hbm [resolvable:$true] %s797_s23 }
  0x99   :  { %s306_s21 = scalar_lea.hbm %s1174_s1, %s471_s9  ;;  %s799_s17 = scalar_lea.hbm %s798_s23, 1 }
  0x9a   :  { %p800_p13 = scmp.ne.s32.totalorder %s798_s23, %s799_s17  ;;  %p802_p0 = scmp.lt.s32.totalorder %s798_s23, %s1174_s1 }
  0x9b   :  { %p803_p1 = scmp.lt.s32.totalorder %s1020_s16, %s799_s17 }
  0x9d   :  { %p804_p2 = por %p803_p1, %p802_p0 }
  0x9f   :  { %p805_p3 = pnand %p804_p2, %p800_p13 }
  0xa1   :  { %808 = shalt.err (!%p805_p3)  }
  0xa2   :  { %301 = dma.hbm_to_vmem [thread:$0]  %s297_s27, 16, %s299_s28, [#allocation3] }
  0xa3   :  { %s315_s2 = sshll.u32 %s306_s21, 4  ;;  %s325_s26 = scalar_lea.hbm %s1174_s1, %s1127_s11  ;;  %s316_s2 = int_to_ptr.hbm [resolvable:$true] %s315_s2 }
  0xa4   :  { %s821_s30 = sshra.s32 %s316_s2, 4  ;;  %s822_s30 = int_to_ptr.hbm [resolvable:$true] %s821_s30 }
  0xa5   :  { %s823_s20 = scalar_lea.hbm %s822_s30, 1  ;;  %p826_p5 = scmp.lt.s32.totalorder %s822_s30, %s1174_s1 }
  0xa6   :  { %p824_p4 = scmp.ne.s32.totalorder %s822_s30, %s823_s20  ;;  %p827_p6 = scmp.lt.s32.totalorder %s1020_s16, %s823_s20 }
  0xa8   :  { %p828_p7 = por %p827_p6, %p826_p5 }
  0xaa   :  { %p829_p8 = pnand %p828_p7, %p824_p4 }
  0xac   :  { %832 = shalt.err (!%p829_p8)  }
  0xad   :  { %320 = dma.hbm_to_vmem [thread:$0]  %s316_s2, 16, %s318_s10, [#allocation3] }
  0xae   :  { %s334_s8 = sshll.u32 %s325_s26, 4  ;;  %s473_s9 = sld [smem:[#allocation5 + $0x86]]  ;;  %s335_s8 = int_to_ptr.hbm [resolvable:$true] %s334_s8 }
  0xaf   :  { %s845_s25 = sshra.s32 %s335_s8, 4  ;;  %s846_s25 = int_to_ptr.hbm [resolvable:$true] %s845_s25 }
  0xb0   :  { %s847_s28 = scalar_lea.hbm %s846_s25, 1  ;;  %p850_p10 = scmp.lt.s32.totalorder %s846_s25, %s1174_s1 }
  0xb1   :  { %p848_p9 = scmp.ne.s32.totalorder %s846_s25, %s847_s28  ;;  %p851_p11 = scmp.lt.s32.totalorder %s1020_s16, %s847_s28 }
  0xb3   :  { %p852_p12 = por %p851_p11, %p850_p10 }
  0xb5   :  { %p853_p13 = pnand %p852_p12, %p848_p9 }
  0xb7   :  { %856 = shalt.err (!%p853_p13)  }
  0xb8   :  { %339 = dma.hbm_to_vmem [thread:$0]  %s335_s8, 16, %s337_s19, [#allocation3] }
  0xb9   :  { %s965_s13 = smov [#allocation2 + $0xe]   ;;  %s474_s10 = sld [smem:[#allocation5 + $0x87]] }
  0xba   :  { %s355_s14 = sshll.u32 %s965_s13, 4  ;;  %s344_s18 = scalar_lea.hbm %s1174_s1, %s473_s9  ;;  %s356_s14 = int_to_ptr.vmem [resolvable:$true] %s355_s14 }
  0xbb   :  { %s353_s12 = sshll.u32 %s344_s18, 4  ;;  %s966_s6 = smov [#allocation2 + $0xf]   ;;  %s354_s12 = int_to_ptr.hbm [resolvable:$true] %s353_s12 }
  0xbc   :  { %s374_s21 = sshll.u32 %s966_s6, 4  ;;  %s869_s23 = sshra.s32 %s354_s12, 4  ;;  %s870_s23 = int_to_ptr.hbm [resolvable:$true] %s869_s23  ;;  %s375_s21 = int_to_ptr.vmem [resolvable:$true] %s374_s21 }
  0xbd   :  { %s871_s17 = scalar_lea.hbm %s870_s23, 1  ;;  %p874_p1 = scmp.lt.s32.totalorder %s870_s23, %s1174_s1 }
  0xbe   :  { %p872_p0 = scmp.ne.s32.totalorder %s870_s23, %s871_s17  ;;  %p875_p2 = scmp.lt.s32.totalorder %s1020_s16, %s871_s17 }
  0xc0   :  { %p876_p3 = por %p875_p2, %p874_p1 }
  0xc2   :  { %p877_p4 = pnand %p876_p3, %p872_p0 }
  0xc4   :  { %880 = shalt.err (!%p877_p4)  }
  0xc5   :  { %358 = dma.hbm_to_vmem [thread:$0]  %s354_s12, 16, %s356_s14, [#allocation3] }
  0xc6   :  { %s363_s22 = scalar_lea.hbm %s1174_s1, %s474_s10 }
  0xc7   :  { %s372_s29 = sshll.u32 %s363_s22, 4  ;;  %s373_s29 = int_to_ptr.hbm [resolvable:$true] %s372_s29 }
  0xc8   :  { %s893_s26 = sshra.s32 %s373_s29, 4  ;;  %s894_s26 = int_to_ptr.hbm [resolvable:$true] %s893_s26 }
  0xc9   :  { %s895_s30 = scalar_lea.hbm %s894_s26, 1  ;;  %p898_p6 = scmp.lt.s32.totalorder %s894_s26, %s1174_s1 }
  0xca   :  { %p896_p5 = scmp.ne.s32.totalorder %s894_s26, %s895_s30  ;;  %p899_p7 = scmp.lt.s32.totalorder %s1020_s16, %s895_s30 }
  0xcc   :  { %p900_p8 = por %p899_p7, %p898_p6 }
  0xce   :  { %p901_p9 = pnand %p900_p8, %p896_p5 }
  0xd0   :  { %904 = shalt.err (!%p901_p9)  }
  0xd1   :  { %377 = dma.hbm_to_vmem [thread:$0]  %s373_s29, 16, %s375_s21, [#allocation3] }
  0xd2   :  { %945 = dma.done.wait [#allocation3], 256 }
  0xd3   :  { %946 = vsyncadd [#allocation3], 4294967040  ;;  %s967_s5 = smov [#allocation9]   ;;  %s425_s28 = sshll.u32 %s1176_s3, 4  ;;  %v411_v0 = vld [vmem:[#allocation6] sm:$0xff]  ;;  %v412_v1 = vld [vmem:[#allocation2] sm:$0xff]  ;;  %s426_s28 = int_to_ptr.hbm [resolvable:$true] %s425_s28 }
  0xd4   :  { %s423_s8 = sshll.u32 %s967_s5, 4  ;;  %v415_v2 = vld [vmem:[#allocation2 + $0x8] sm:$0xff]  ;;  %v413_v3 = vadd.f32 %v412_v1, %v411_v0  ;;  %s968_s1 = smov 128   ;;  %s424_s8 = int_to_ptr.vmem [resolvable:$true] %s423_s8 }
  0xd5   :  { %v416_v4 = vadd.f32 %v415_v2, %v411_v0  ;;  %s969_s16 = smov 8  }
  0xd6   :  { %414 = vst [vmem:[#allocation9] sm:$0xff] %v413_v3 }
  0xd7   :  { %418 = vst [vmem:[#allocation9 + $0x8] sm:$0xff] %v416_v4 }
  0xd8   :  { %431 = dma.vmem_to_hbm [thread:$0]  %s424_s8, 256, %s426_s28, [#allocation8], %s968_s1, %s968_s1, %s969_s16  }
  0xd9   :  { %947 = dma.done.wait [#allocation8], 256  }
  0xda   :  { %948 = vsyncadd [#allocation8], 4294967040 }
  0xdb   :  { %436 = vsyncpa [#allocation7], 1 }
  0xdc   :  { %437 = vsyncpa [#allocation8], 1 }
  0xdd   :  { %438 = vsyncmov [#allocation3] }
  0xe0   :  { %s439_s7 = vpop.sfrf %438 }
  0xe1   :  { %p475_p10 = scmp.ne.s32.totalorder %s439_s7, 0 }
  0xe3   :  { %443 = shalt.err (%p475_p10)  }

</bundles_post_ra>
